<compile_context>
chip_gen: v7x
topology: tpu7x:2x2x1
jax: 0.10.0
libtpu: 0.0.40
codegen_flags: <defaults>
</compile_context>

<pallas_src>
import functools

import jax
import jax.numpy as jnp
from jax import lax
from jax.experimental import pallas as pl
from jax.experimental.pallas import tpu as pltpu

_LANE = 128   # lane granularity (last dim of any block)
_SUB = 8      # sublane granularity for f32 blocks (x and output)


def _round_up(v, m):
    return (v + m - 1) // m * m


def _num_tensorcores_per_device():
    """Best-effort TensorCore count per device (2 on v7x, 1 on v5e/v6e).
    Returns 1 on any failure so the megacore N-split is skipped safely."""
    try:
        d = jax.devices()[0]
        for attr in ("num_cores", "core_count"):
            v = getattr(d, attr, None)
            if isinstance(v, int) and v > 0:
                return v
    except Exception:
        pass
    return 1


def _physical_vmem_bytes():
    try:
        return int(pltpu.get_tpu_info().vmem_capacity_bytes)
    except Exception:
        return 64 * 1024 * 1024  # conservative (v7x per-TC size)


def _select_nk_tiles(N, K, tn, tk):
    """Tile sizes / padded extents for the weight dims. Shared between
    prepare_mzi_weight and the forward so the prepared layout always matches."""
    n_al = _round_up(N, _LANE)
    k_al = _round_up(K, _LANE)
    tn_ = min(_round_up(tn, _LANE), n_al)
    tk_ = min(_round_up(tk, _LANE), k_al)
    N_p = _round_up(N, tn_)
    K_p = _round_up(K, tk_)
    return tn_, tk_, N_p, K_p


# ----------------------------------------------------------------------------
# Kernels. Weight arrives pre-transposed as (K, N), so the contraction is a
# plain (tm, tk) @ (tk, tn) with no in-kernel transpose.
# ----------------------------------------------------------------------------
def _mzi_kernel_single_k(x_ref, w_ref, o_ref, *, compute_dtype):
    x = x_ref[...]
    if x.dtype != compute_dtype:
        x = x.astype(compute_dtype)           # VPU cast, free under the MXU
    o_ref[...] = jnp.dot(x, w_ref[...], preferred_element_type=jnp.float32)


def _mzi_kernel_multi_k(x_ref, w_ref, o_ref, *, compute_dtype):
    k = pl.program_id(2)

    @pl.when(k == 0)
    def _():
        o_ref[...] = jnp.zeros_like(o_ref)

    x = x_ref[...]
    if x.dtype != compute_dtype:
        x = x.astype(compute_dtype)
    o_ref[...] += jnp.dot(x, w_ref[...], preferred_element_type=jnp.float32)


# ----------------------------------------------------------------------------
# One-time weight preparation (hoisted out of the hot path).
# ----------------------------------------------------------------------------
def prepare_mzi_weight(weight, *, tn=2048, tk=512, compute_dtype=jnp.float32):
    """Cast to the compute dtype, transpose to (K, N) and zero-pad to tile
    multiples. Do this once per weight; reuse across forward calls."""
    N, K = weight.shape
    _, _, N_p, K_p = _select_nk_tiles(N, K, tn, tk)
    w = jnp.transpose(weight.astype(compute_dtype))        # (K, N)
    if (K_p, N_p) != (K, N):
        w = jnp.pad(w, ((0, K_p - K), (0, N_p - N)))
    return w


# ----------------------------------------------------------------------------
# Forward with a prepared weight (hot path).
# ----------------------------------------------------------------------------
@functools.partial(
    jax.jit,
    static_argnames=("out_features", "tm", "tn", "tk", "compute_dtype"))
def mzi_layer_forward_prepared(x, w_prep, *, out_features,
                               tm=1024, tn=2048, tk=512,
                               compute_dtype=jnp.float32):
    M, K = x.shape
    N = out_features
    tn_, tk_, N_p, K_p = _select_nk_tiles(N, K, tn, tk)
    assert w_prep.shape == (K_p, N_p), (w_prep.shape, (K_p, N_p))

    # ---- M tiling ---------------------------------------------------------
    m_al = _round_up(M, _SUB)
    tm_ = min(_round_up(tm, _SUB), m_al)

    # ---- VMEM budget (double-buffered inputs + double-buffered f32 output) --
    x_bytes = jnp.dtype(x.dtype).itemsize
    w_bytes = jnp.dtype(compute_dtype).itemsize

    def footprint(tm_v, tn_v, tk_v):
        return (2 * (tm_v * tk_v * x_bytes + tk_v * tn_v * w_bytes)
                + 2 * tm_v * tn_v * 4)

    phys_vmem = _physical_vmem_bytes()
    vmem_cap = min(int(phys_vmem * 0.85), 112 * 1024 * 1024)

    # Shrink only the M tile if the plan overshoots this chip's VMEM
    # (never touches the weight-dim tiles, so w_prep stays valid).
    while (footprint(tm_, tn_, tk_) > vmem_cap
           and tm_ % (2 * _SUB) == 0 and tm_ > 128):
        tm_ //= 2

    M_p = _round_up(M, tm_)

    # ---- megacore: only on >=2-TensorCore chips, split N (never M).
    #      Halving tn_ keeps N_p a multiple of tn_ and keeps tiles lane-dense.
    num_cores = _num_tensorcores_per_device()
    if num_cores >= 2:
        while ((M_p // tm_) * (N_p // tn_) < num_cores
               and tn_ % (2 * _LANE) == 0 and tn_ // 2 >= 2 * _LANE):
            tn_ //= 2

    grid_m, grid_n, grid_k = M_p // tm_, N_p // tn_, K_p // tk_

    # ---- pad x (zero K padding is exact for a matmul) -----------------------
    xp = x
    if (M_p, K_p) != (M, K):
        xp = jnp.pad(xp, ((0, M_p - M), (0, K_p - K)))

    vmem_limit = min(max(int(footprint(tm_, tn_, tk_) * 1.25), 32 * 1024 * 1024),
                     vmem_cap)

    cost = pl.CostEstimate(
        flops=2 * M_p * N_p * K_p,
        transcendentals=0,
        bytes_accessed=M_p * K_p * x_bytes + K_p * N_p * w_bytes + M_p * N_p * 4,
    )

    if grid_k == 1:
        kern = functools.partial(_mzi_kernel_single_k, compute_dtype=compute_dtype)
        grid = (grid_m, grid_n)
        in_specs = [
            pl.BlockSpec((tm_, tk_), lambda i, j: (i, 0)),
            pl.BlockSpec((tk_, tn_), lambda i, j: (0, j)),
        ]
        out_specs = pl.BlockSpec((tm_, tn_), lambda i, j: (i, j))
        dim_sem = ("parallel", "parallel")
    else:
        kern = functools.partial(_mzi_kernel_multi_k, compute_dtype=compute_dtype)
        grid = (grid_m, grid_n, grid_k)            # reduction axis last
        in_specs = [
            pl.BlockSpec((tm_, tk_), lambda i, j, k: (i, k)),
            pl.BlockSpec((tk_, tn_), lambda i, j, k: (k, j)),
        ]
        out_specs = pl.BlockSpec((tm_, tn_), lambda i, j, k: (i, j))
        dim_sem = ("parallel", "parallel", "arbitrary")

    y = pl.pallas_call(
        kern,
        out_shape=jax.ShapeDtypeStruct((M_p, N_p), jnp.float32),
        grid_spec=pltpu.PrefetchScalarGridSpec(
            num_scalar_prefetch=0,
            grid=grid,
            in_specs=in_specs,
            out_specs=out_specs,
        ),
        compiler_params=pltpu.CompilerParams(
            dimension_semantics=dim_sem,
            vmem_limit_bytes=vmem_limit,
        ),
        cost_estimate=cost,
    )(xp, w_prep)

    if (M_p, N_p) != (M, N):
        y = y[:M, :N]
    return y


def mzi_layer_forward(x, weight, *, tm=1024, tn=2048, tk=512,
                      compute_dtype=jnp.float32):
    """Convenience entry point: y = x @ weight.T with weight in its native
    (out_features, in_features) layout. For repeated calls, call
    prepare_mzi_weight once and use mzi_layer_forward_prepared directly."""
    w_prep = prepare_mzi_weight(weight, tn=tn, tk=tk, compute_dtype=compute_dtype)
    return mzi_layer_forward_prepared(
        x, w_prep, out_features=weight.shape[0],
        tm=tm, tn=tn, tk=tk, compute_dtype=compute_dtype)


def init_mzi_weight(key, in_features, out_features, dtype=jnp.float32):
    """Re-implementation of MZILayer.reset_parameters():
    xavier_uniform_(gain=1.0) followed by += 0.1 * randn_like(weight)."""
    k_xav, k_noise = jax.random.split(key)
    bound = jnp.sqrt(6.0 / (in_features + out_features)).astype(dtype)
    w = jax.random.uniform(
        k_xav, (out_features, in_features), dtype=dtype, minval=-bound, maxval=bound)
    w = w + 0.1 * jax.random.normal(k_noise, (out_features, in_features), dtype=dtype)
    return w


if __name__ == "__main__":
    key = jax.random.PRNGKey(0)
    k_w, k_x, k_w2, k_x2, k_w3, k_x3 = jax.random.split(key, 6)

    # --- small, aligned shapes: default exact-f32 path -----------------------
    batch, in_features, out_features = 16, 64, 32
    weight = init_mzi_weight(k_w, in_features, out_features)     # (out, in)
    x = jax.random.normal(k_x, (batch, in_features), dtype=jnp.float32)

    y_ref = jnp.dot(x, weight.T, precision=lax.Precision.HIGHEST)
    y = jax.block_until_ready(mzi_layer_forward(x, weight))
    assert y.shape == (batch, out_features)
    assert jnp.allclose(y, y_ref, atol=1e-4, rtol=1e-4), "mismatch (f32 path)"

    # --- prepared-weight hot path (weight prep hoisted) + bf16 fast path -----
    w_prep_bf16 = prepare_mzi_weight(weight, compute_dtype=jnp.bfloat16)
    y_bf16 = jax.block_until_ready(
        mzi_layer_forward_prepared(x, w_prep_bf16, out_features=out_features,
                                   compute_dtype=jnp.bfloat16))
    assert jnp.allclose(y_bf16, y_ref, atol=1e-1, rtol=2e-2), "mismatch (bf16 path)"

    # --- non-aligned shapes exercise the zero-padding edge handling ----------
    b2, in2, out2 = 10, 40, 24
    w2 = init_mzi_weight(k_w2, in2, out2)
    x2 = jax.random.normal(k_x2, (b2, in2), dtype=jnp.float32)
    y2 = jax.block_until_ready(mzi_layer_forward(x2, w2))
    y2_ref = jnp.dot(x2, w2.T, precision=lax.Precision.HIGHEST)
    assert y2.shape == (b2, out2)
    assert jnp.allclose(y2, y2_ref, atol=1e-4, rtol=1e-4), "mismatch (padded path)"

    # --- force the K-split (3-D grid, resident-output accumulation) path -----
    b3, in3, out3 = 16, 256, 32
    w3 = init_mzi_weight(k_w3, in3, out3)
    x3 = jax.random.normal(k_x3, (b3, in3), dtype=jnp.float32)
    y3 = jax.block_until_ready(mzi_layer_forward(x3, w3, tk=128))
    y3_ref = jnp.dot(x3, w3.T, precision=lax.Precision.HIGHEST)
    assert jnp.allclose(y3, y3_ref, atol=1e-4, rtol=1e-4), "mismatch (multi-k path)"

    print("KERNEL_OK")
</pallas_src>

<mosaic_0001>
module attributes {stable_mosaic.version = 11 : i64} {
  func.func @_mzi_kernel_single_k(%arg0: i32, %arg1: i32, %arg2: memref<16x128xf32, #tpu.memory_space<vmem>>, %arg3: memref<128x128xf32, #tpu.memory_space<vmem>>, %arg4: memref<16x128xf32, #tpu.memory_space<vmem>>) attributes {dimension_semantics = [#tpu.dimension_semantics<parallel>, #tpu.dimension_semantics<parallel>], iteration_bounds = array<i64: 1, 1>, scalar_prefetch = 0 : i64, scratch_operands = 0 : i64, tpu.core_type = #tpu.core_type<tc>, window_params = [{transform_indices = @transform_0, window_bounds = array<i64: 16, 128>}, {transform_indices = @transform_1, window_bounds = array<i64: 128, 128>}, {transform_indices = @transform_2, window_bounds = array<i64: 16, 128>}]} {
    %c0 = arith.constant 0 : index
    %c0_0 = arith.constant 0 : index
    %0 = vector.load %arg2[%c0, %c0_0] : memref<16x128xf32, #tpu.memory_space<vmem>>, vector<16x128xf32>
    %c0_1 = arith.constant 0 : index
    %c0_2 = arith.constant 0 : index
    %1 = vector.load %arg3[%c0_1, %c0_2] : memref<128x128xf32, #tpu.memory_space<vmem>>, vector<128x128xf32>
    %cst = arith.constant dense<0.000000e+00> : vector<16x128xf32>
    %2 = tpu.matmul %0, %1, %cst {dimension_numbers = #tpu.dot_dimension_numbers<[1], [0], [0], [1], [0, 0, 1, 1], [], []>} : vector<16x128xf32>, vector<128x128xf32>, vector<16x128xf32> -> vector<16x128xf32>
    %c0_3 = arith.constant 0 : index
    %c0_4 = arith.constant 0 : index
    %3 = vector.load %arg4[%c0_3, %c0_4] : memref<16x128xf32, #tpu.memory_space<vmem>>, vector<16x128xf32>
    tpu.vector_store %arg4[%c0_3, %c0_4], %2 {strides = array<i32>} : memref<16x128xf32, #tpu.memory_space<vmem>>, vector<16x128xf32>,
    return
  }
  func.func @transform_0(%arg0: i32, %arg1: i32) -> (i32, i32) {
    %c0_i32 = arith.constant 0 : i32
    %c0_i32_0 = arith.constant 0 : i32
    return %arg0, %c0_i32 : i32, i32
  }
  func.func @transform_1(%arg0: i32, %arg1: i32) -> (i32, i32) {
    %c0_i32 = arith.constant 0 : i32
    %c0_i32_0 = arith.constant 0 : i32
    return %c0_i32, %arg1 : i32, i32
  }
  func.func @transform_2(%arg0: i32, %arg1: i32) -> (i32, i32) {
    %c0_i32 = arith.constant 0 : i32
    return %arg0, %arg1 : i32, i32
  }
}

</mosaic_0001>

<bundles_post_ra>
// kernel: mzi_layer_forward_prepared.1
= control target key start
LH: loop header
LB: loop body
LE: loop exit
PB: predicated region body
PF: predicated region fallthrough
CT: control target
= control target key end

     0   :  { %7 = vsyncpa [#allocation3], 0  ;;  %s330_s0 = inlined_call_operand.vmem [shape: f32[16,128], index: 0, kind: input, shape index: {}]   ;;  %s331_s1 = inlined_call_operand.hbm [shape: f32[128,128], index: 1, kind: input, shape index: {}]   ;;  %s332_s2 = inlined_call_operand.hbm [shape: f32[16,128], index: 2, kind: output, shape index: {}]  }
   0x1   :  { %8 = vsyncpa [#allocation4], 0  ;;  %s275_s9 = smov [#allocation2]   ;;  %s227_s13 = scalar_lea.hbm %s331_s1, 2048 }
   0x2   :  { %s16_s10 = sshll.u32 %s275_s9, 4  ;;  %p228_p0 = scmp.ne.s32.totalorder %s331_s1, %s227_s13  ;;  %s17_s10 = int_to_ptr.vmem [resolvable:$true] %s16_s10 }
   0x3   :  { %p231_p1 = scmp.lt.u32.totalorder %s227_s13, %s331_s1 }
   0x5   :  { %p233_p2 = pnand %p231_p1, %p228_p0 }
   0x7   :  { %236 = shalt.err (!%p233_p2)
}
   0x8   :  { %s237_s18 = scalar_lea.vmem %s17_s10, 2048  ;;  %p242_p4 = scmp.lt.s32.totalorder %s17_s10, %s17_s10 }
   0x9   :  { %p238_p3 = scmp.ne.s32.totalorder %s17_s10, %s237_s18  ;;  %p243_p5 = scmp.lt.s32.totalorder %s237_s18, %s237_s18 }
   0xb   :  { %p244_p6 = por %p243_p5, %p242_p4 }
   0xd   :  { %p245_p7 = pnand %p244_p6, %p238_p3 }
   0xf   :  { %248 = shalt.err (!%p245_p7)
}
  0x10   :  { %s276_s19 = smov 128   ;;  %s277_s20 = smov 8  }
  0x11   :  { %22 = dma.hbm_to_vmem [thread:$0]  %s331_s1, 2048, %s17_s10, [#allocation3], %s276_s19, %s276_s19, %s277_s20  }
  0x12   :  { %271 = dma.done.wait [#allocation3], 2048  }
  0x13   :  { %272 = vsyncadd [#allocation3], 4294965248  ;;  %v28_v0 = vld [vmem:[#allocation2] sm:$0xff]  ;;  %v29_v1 = vld [vmem:[#allocation2 + $0x8] sm:$0xff]  ;;  %s278_s26 = smov [#allocation5]  }
  0x14   :  { %v30_v2 = vld [vmem:[#allocation2 + $0x10] sm:$0xff]  ;;  %v191_v3 = vpack.c.bf16 %v29_v1, %v28_v0  ;;  %v31_v4 = vld [vmem:[#allocation2 + $0x18] sm:$0xff]  ;;  %v32_v6 = vld [vmem:[#allocation2 + $0x20] sm:$0xff]  ;;  %s126_s27 = sshll.u32 %s278_s26, 4  ;;  %s127_s27 = int_to_ptr.vmem [resolvable:$true] %s126_s27 }
  0x15   :  { %v195_v5 = vpack.c.bf16 %v31_v4, %v30_v2  ;;  %v33_v7 = vld [vmem:[#allocation2 + $0x28] sm:$0xff]  ;;  %v26_v9 = vld [vmem:[%s330_s0] sm:$0xff]  ;;  %v34_v10 = vld [vmem:[#allocation2 + $0x30] sm:$0xff]  ;;  %s249_s28 = scalar_lea.vmem %s127_s27, 256  ;;  %p254_p9 = scmp.lt.s32.totalorder %s127_s27, %s127_s27 }
  0x16   :  { %192 = vmatprep.subr.bf16.mxu0 %v191_v3  ;;  %v199_v8 = vpack.c.bf16 %v33_v7, %v32_v6  ;;  %v35_v11 = vld [vmem:[#allocation2 + $0x38] sm:$0xff]  ;;  %188 = vmatprep.mubr.f32.mxu0 %v26_v9  ;;  %v36_v13 = vld [vmem:[#allocation2 + $0x40] sm:$0xff]  ;;  %v37_v14 = vld [vmem:[#allocation2 + $0x48] sm:$0xff]  ;;  %p250_p8 = scmp.ne.s32.totalorder %s127_s27, %s249_s28  ;;  %p255_p10 = scmp.lt.s32.totalorder %s249_s28, %s249_s28 }
  0x17   :  { %194 = vmatpush3.bf16.msra.mxu0 %v191_v3  ;;  %v203_v12 = vpack.c.bf16 %v35_v11, %v34_v10  ;;  %v207_v15 = vpack.c.bf16 %v37_v14, %v36_v13  ;;  %v38_v16 = vld [vmem:[#allocation2 + $0x50] sm:$0xff]  ;;  %v39_v17 = vld [vmem:[#allocation2 + $0x58] sm:$0xff]  ;;  %v40_v19 = vld [vmem:[#allocation2 + $0x60] sm:$0xff] }
  0x18   :  { %196 = vmatprep.subr.bf16.mxu0 %v195_v5  ;;  %v211_v18 = vpack.c.bf16 %v39_v17, %v38_v16  ;;  %v41_v20 = vld [vmem:[#allocation2 + $0x68] sm:$0xff]  ;;  %v42_v22 = vld [vmem:[#allocation2 + $0x70] sm:$0xff]  ;;  %v43_v23 = vld [vmem:[#allocation2 + $0x78] sm:$0xff]  ;;  %p256_p11 = por %p255_p10, %p254_p9 }
  0x19   :  { %v215_v21 = vpack.c.bf16 %v41_v20, %v40_v19  ;;  %v219_v24 = vpack.c.bf16 %v43_v23, %v42_v22  ;;  %v27_v25 = vld [vmem:[%s330_s0 + $0x8] sm:$0xff] }
  0x1a   :  { %p257_p12 = pnand %p256_p11, %p250_p8 }
  0x1b   :  { %198 = vmatpush3.bf16.msra.mxu0 %v195_v5 }
  0x1c   :  { %200 = vmatprep.subr.bf16.mxu0 %v199_v8 }
  0x1f   :  { %202 = vmatpush3.bf16.msra.mxu0 %v199_v8 }
  0x20   :  { %204 = vmatprep.subr.bf16.mxu0 %v203_v12 }
  0x23   :  { %206 = vmatpush3.bf16.msra.mxu0 %v203_v12 }
  0x24   :  { %208 = vmatprep.subr.bf16.mxu0 %v207_v15 }
  0x27   :  { %210 = vmatpush3.bf16.msra.mxu0 %v207_v15 }
  0x28   :  { %212 = vmatprep.subr.bf16.mxu0 %v211_v18 }
  0x2b   :  { %214 = vmatpush3.bf16.msra.mxu0 %v211_v18 }
  0x2c   :  { %216 = vmatprep.subr.bf16.mxu0 %v215_v21 }
  0x2f   :  { %218 = vmatpush3.bf16.msra.mxu0 %v215_v21 }
  0x30   :  { %220 = vmatprep.subr.bf16.mxu0 %v219_v24 }
  0x33   :  { %222 = vmatpush3.bf16.msra.mxu0 %v219_v24 }
  0x36   :  { %189 = vmatmul.mubr.f32.vlgmr.msra.gmra.mrb[0].mxu0 %v27_v25 }
 0x109   :  { %v190_v26 = vpop.f32.mrb[0].mxu0 }
 0x10a   :  { %120 = vst [vmem:[#allocation5 + $0x8] sm:$0xff] %v190_v26  ;;  %v110_v27 = vpop.f32.mrb[1].mxu0 }
 0x10b   :  { %119 = vst [vmem:[#allocation5] sm:$0xff] %v110_v27 }
 0x10c   :  { %260 = shalt.err (!%p257_p12)
}
 0x10d   :  { %s261_s3 = scalar_lea.hbm %s332_s2, 256 }
 0x10e   :  { %p262_p13 = scmp.ne.s32.totalorder %s332_s2, %s261_s3  ;;  %p265_p0 = scmp.lt.u32.totalorder %s261_s3, %s332_s2 }
 0x110   :  { %p267_p1 = pnand %p265_p0, %p262_p13 }
 0x112   :  { %270 = shalt.err (!%p267_p1)
}
 0x113   :  { %132 = dma.vmem_to_hbm [thread:$0]  %s127_s27, 256, %s332_s2, [#allocation4], %s276_s19, %s276_s19, %s277_s20  }
 0x114   :  { %273 = dma.done.wait [#allocation4], 256  }
 0x115   :  { %274 = vsyncadd [#allocation4], 4294967040 }
 0x116   :  { %136 = vsyncpa [#allocation3], 1 }
 0x117   :  { %137 = vsyncpa [#allocation4], 1 }

</bundles_post_ra>
